<compile_context>
chip_gen: v7x
topology: tpu7x:2x2x1
jax: 0.10.0
libtpu: 0.0.40
codegen_flags: <defaults>
</compile_context>

<pallas_src>
import functools

import jax
import jax.numpy as jnp
from jax.experimental import pallas as pl
from jax.experimental.pallas import tpu as pltpu

EPS = 1e-5  # torch.nn.InstanceNorm2d default


# ---------------------------------------------------------------- kernel helpers
def _instance_norm(y, inv_hw):
    # y: (Cp, HW) f32. Per-channel normalization over the flattened spatial axis,
    # biased variance via fused moments (single pass over the lanes).
    s1 = jnp.sum(y, axis=1, keepdims=True)
    s2 = jnp.sum(y * y, axis=1, keepdims=True)
    mean = s1 * inv_hw
    var = jnp.maximum(s2 * inv_hw - mean * mean, 0.0)  # clamp fused-moment cancellation
    return (y - mean) * jax.lax.rsqrt(var + EPS)


def _conv3x3_reflect(x, w_r, masks, W, HW, matmul_dtype):
    # x:   (Cp, HW) f32, row-major flatten of (H, W)
    # w_r: (Cp, 9*Cp) matmul_dtype, column index = ((ky*3+kx)*Cp + cin)
    # Reflection-padded 3x3 conv via lane rolls (XLU) + boundary corrections; the
    # nine shifted taps are stacked (8-sublane-aligned since Cp % 8 == 0) and
    # contracted in ONE matmul (no bias: cancelled by the following affine-free IN).
    first_col, last_col, first_row, last_row = masks

    r_left = pltpu.roll(x, shift=1, axis=1)         # x_flat[p-1]  (w-1, interior)
    r_right = pltpu.roll(x, shift=HW - 1, axis=1)   # x_flat[p+1]  (w+1, interior)

    # Horizontal taps with reflect at the W boundaries (exact incl. corners,
    # because vertical reflection is applied afterwards on these).
    xh = (
        jnp.where(first_col, r_right, r_left),      # dx = -1 : x[h, r(w-1)]
        x,                                          # dx =  0
        jnp.where(last_col, r_left, r_right),       # dx = +1 : x[h, r(w+1)]
    )

    # Vertical taps (roll by a whole row) with reflect at the H boundaries.
    taps = []
    for xdx in xh:
        up = pltpu.roll(xdx, shift=W, axis=1)       # xdx[h-1, w] (interior)
        dn = pltpu.roll(xdx, shift=HW - W, axis=1)  # xdx[h+1, w] (interior)
        taps.append((
            jnp.where(first_row, dn, up),           # dy = -1
            xdx,                                    # dy =  0
            jnp.where(last_row, up, dn),            # dy = +1
        ))

    # Stack in tap order tap = (dy+1)*3 + (dx+1) -> rows = tap*Cp + cin.
    # Cp is a multiple of 8, so every concat boundary is 8-sublane aligned.
    stacked = jnp.concatenate(
        [taps[dx_i][dy_i] for dy_i in range(3) for dx_i in range(3)], axis=0)

    # One lane-dense MXU pass: (Cp, 9*Cp) @ (9*Cp, HW), bf16 operands, f32 accum.
    return jnp.dot(w_r, stacked.astype(matmul_dtype),
                   preferred_element_type=jnp.float32)


def resnet_block_kernel(x_ref, w1_ref, w2_ref, out_ref, *, B, H, W, matmul_dtype):
    HW = H * W
    inv_hw = 1.0 / HW

    # Boundary masks: built once per invocation (grid folded), shared by both convs
    # and all images. Use &/>> when W is a power of two (decided at trace time).
    lane = jax.lax.broadcasted_iota(jnp.int32, (1, HW), 1)
    if (W & (W - 1)) == 0:
        col = lane & (W - 1)
        row = lane >> (W.bit_length() - 1)
    else:
        col = lane % W
        row = lane // W
    masks = (col == 0, col == W - 1, row == 0, row == H - 1)

    # Weights loaded once, kept resident across the per-image loop.
    w1 = w1_ref[...]
    w2 = w2_ref[...]

    def body(b, carry):
        x = x_ref[b].astype(jnp.float32)            # (Cp, HW)

        # Conv -> InstanceNorm -> ReLU
        y = _conv3x3_reflect(x, w1, masks, W, HW, matmul_dtype)
        y = _instance_norm(y, inv_hw)
        y = jnp.maximum(y, 0.0)

        # Conv -> InstanceNorm  (reflect pad folded into the conv itself)
        y = _conv3x3_reflect(y, w2, masks, W, HW, matmul_dtype)
        y = _instance_norm(y, inv_hw)

        # Residual add (f32), then store lane-dense.
        out_ref[b] = (x + y).astype(out_ref.dtype)
        return carry

    jax.lax.fori_loop(0, B, body, 0, unroll=True)


# ---------------------------------------------------------------- wrapper
def resnet_block(x_nchw, w1_hwio, b1, w2_hwio, b2, *, matmul_dtype=jnp.bfloat16):
    """x_nchw: (B, C, H, W); w*_hwio: (3, 3, Cin, Cout); b*: (C,). Returns (B, C, H, W).

    b1/b2 are accepted for module-API parity but intentionally unused: a per-channel
    bias immediately before an affine-free InstanceNorm cancels exactly.
    """
    del b1, b2  # mathematically dead through affine-free InstanceNorm

    B, C, H, W = x_nchw.shape
    HW = H * W
    Cp = -(-C // 8) * 8  # round channels up to 8 sublanes (no-op when C % 8 == 0)

    # Layout plumbing only (no compute hoisting): NCHW flattens directly to (B, C, HW);
    # pad channels with zeros so every vreg is fully occupied and the 9*Cp tap stack
    # is 8-sublane aligned. Zero channels stay exactly zero through conv/IN/residual.
    x_flat = x_nchw.reshape(B, C, HW)
    if Cp != C:
        x_flat = jnp.pad(x_flat, ((0, 0), (0, Cp - C), (0, 0)))

    def pack_w(w_hwio):
        # (KH, KW, Cin, Cout) -> (Cout, KH, KW, Cin) -> (Cp, 9*Cp),
        # column index = (ky*3 + kx)*Cp + cin, matching the in-kernel tap stack.
        w = jnp.transpose(w_hwio, (3, 0, 1, 2))
        if Cp != C:
            w = jnp.pad(w, ((0, Cp - C), (0, 0), (0, 0), (0, Cp - C)))
        return w.reshape(Cp, 9 * Cp).astype(matmul_dtype)

    w1r = pack_w(w1_hwio)
    w2r = pack_w(w2_hwio)

    out_flat = pl.pallas_call(
        functools.partial(resnet_block_kernel, B=B, H=H, W=W,
                          matmul_dtype=matmul_dtype),
        out_shape=jax.ShapeDtypeStruct((B, Cp, HW), x_nchw.dtype),
        grid_spec=pltpu.PrefetchScalarGridSpec(
            num_scalar_prefetch=0,
            grid=(1,),  # B grid folded: whole batch handled in one invocation
            in_specs=[
                pl.BlockSpec((B, Cp, HW), lambda i: (0, 0, 0)),
                pl.BlockSpec((Cp, 9 * Cp), lambda i: (0, 0)),
                pl.BlockSpec((Cp, 9 * Cp), lambda i: (0, 0)),
            ],
            out_specs=pl.BlockSpec((B, Cp, HW), lambda i: (0, 0, 0)),
        ),
        compiler_params=pltpu.CompilerParams(
            dimension_semantics=("arbitrary",),
            vmem_limit_bytes=32 * 1024 * 1024,
        ),
    )(x_flat, w1r, w2r)

    return out_flat[:, :C, :].reshape(B, C, H, W)


# ---------------------------------------------------------------- pure-JAX reference
def resnet_block_ref(x_nchw, w1_hwio, b1, w2_hwio, b2, matmul_dtype=jnp.float32):
    """Module semantics. matmul_dtype=bf16 reproduces the kernel's MXU-operand
    rounding (accumulation stays f32); f32 is the exact PyTorch-module math."""

    def conv(y, w, b):
        yp = jnp.pad(y, ((0, 0), (0, 0), (1, 1), (1, 1)), mode="reflect")
        out = jax.lax.conv_general_dilated(
            yp.astype(matmul_dtype), w.astype(matmul_dtype),
            window_strides=(1, 1), padding="VALID",
            dimension_numbers=("NCHW", "HWIO", "NCHW"),
            preferred_element_type=jnp.float32)
        return out + b.reshape(1, -1, 1, 1)

    def inorm(y):
        mean = jnp.mean(y, axis=(2, 3), keepdims=True)
        var = jnp.mean((y - mean) ** 2, axis=(2, 3), keepdims=True)
        return (y - mean) * jax.lax.rsqrt(var + EPS)

    y = jnp.maximum(inorm(conv(x_nchw, w1_hwio, b1)), 0.0)
    y = inorm(conv(y, w2_hwio, b2))
    return x_nchw + y


# ---------------------------------------------------------------- main
if __name__ == "__main__":
    B, C, H, W = 2, 4, 16, 16  # dim=4
    key = jax.random.PRNGKey(0)
    k1, k2, k3, k4, k5 = jax.random.split(key, 5)

    # Deterministic parameter init (Conv2d-like uniform bounds).
    fan_in = C * 3 * 3
    bound = 1.0 / (fan_in ** 0.5)
    x_nchw = jax.random.normal(k1, (B, C, H, W), jnp.float32)
    w1 = jax.random.uniform(k2, (3, 3, C, C), jnp.float32, -bound, bound)  # HWIO
    b1 = jax.random.uniform(k3, (C,), jnp.float32, -bound, bound)
    b2 = jax.random.uniform(k5, (C,), jnp.float32, -bound, bound)
    w2 = jax.random.uniform(k4, (3, 3, C, C), jnp.float32, -bound, bound)  # HWIO

    out = jax.block_until_ready(resnet_block(x_nchw, w1, b1, w2, b2))
    assert out.shape == (B, C, H, W)

    # Tight check against a reference that applies the same bf16 MXU-operand
    # rounding as the kernel (accumulation in f32 in both).
    ref_bf16 = resnet_block_ref(x_nchw, w1, b1, w2, b2, matmul_dtype=jnp.bfloat16)
    err_bf16 = float(jnp.max(jnp.abs(out - ref_bf16)))
    assert jnp.allclose(out, ref_bf16, atol=2e-3, rtol=2e-3), err_bf16

    # Module-semantics check against the exact f32 reference; slack covers the
    # bf16 operand rounding of the MXU inputs.
    ref_f32 = resnet_block_ref(x_nchw, w1, b1, w2, b2, matmul_dtype=jnp.float32)
    err_f32 = float(jnp.max(jnp.abs(out - ref_f32)))
    assert jnp.allclose(out, ref_f32, atol=5e-2, rtol=5e-2), err_f32

    print("KERNEL_OK")
</pallas_src>

<mosaic_0001>
module attributes {stable_mosaic.version = 11 : i64} {
  func.func @resnet_block_kernel(%arg0: i32, %arg1: memref<2x8x256xf32, #tpu.memory_space<vmem>>, %arg2: memref<8x72xbf16, #tpu.memory_space<vmem>>, %arg3: memref<8x72xbf16, #tpu.memory_space<vmem>>, %arg4: memref<2x8x256xf32, #tpu.memory_space<vmem>>) attributes {dimension_semantics = [#tpu.dimension_semantics<arbitrary>], iteration_bounds = array<i64: 1>, scalar_prefetch = 0 : i64, scratch_operands = 0 : i64, tpu.core_type = #tpu.core_type<tc>, window_params = [{pipeline_mode = #tpu.pipeline_mode<synchronous>, transform_indices = @transform_0, window_bounds = array<i64: 2, 8, 256>}, {pipeline_mode = #tpu.pipeline_mode<synchronous>, transform_indices = @transform_1, window_bounds = array<i64: 8, 72>}, {pipeline_mode = #tpu.pipeline_mode<synchronous>, transform_indices = @transform_2, window_bounds = array<i64: 8, 72>}, {pipeline_mode = #tpu.pipeline_mode<synchronous>, transform_indices = @transform_3, window_bounds = array<i64: 2, 8, 256>}]} {
    %0 = tpu.iota {dimensions = array<i32: 1>} : vector<1x256xi32>
    %c15_i32 = arith.constant 15 : i32
    %1 = vector.broadcast %c15_i32 : i32 to vector<1x256xi32>
    %2 = arith.andi %0, %1 : vector<1x256xi32>
    %c4_i32 = arith.constant 4 : i32
    %3 = vector.broadcast %c4_i32 : i32 to vector<1x256xi32>
    %4 = arith.shrsi %0, %3 : vector<1x256xi32>
    %c0_i32 = arith.constant 0 : i32
    %5 = vector.broadcast %c0_i32 : i32 to vector<1x256xi32>
    %6 = arith.cmpi eq, %2, %5 : vector<1x256xi32>
    %c15_i32_0 = arith.constant 15 : i32
    %7 = vector.broadcast %c15_i32_0 : i32 to vector<1x256xi32>
    %8 = arith.cmpi eq, %2, %7 : vector<1x256xi32>
    %c0_i32_1 = arith.constant 0 : i32
    %9 = vector.broadcast %c0_i32_1 : i32 to vector<1x256xi32>
    %10 = arith.cmpi eq, %4, %9 : vector<1x256xi32>
    %c15_i32_2 = arith.constant 15 : i32
    %11 = vector.broadcast %c15_i32_2 : i32 to vector<1x256xi32>
    %12 = arith.cmpi eq, %4, %11 : vector<1x256xi32>
    %c0 = arith.constant 0 : index
    %c0_3 = arith.constant 0 : index
    %13 = vector.load %arg2[%c0, %c0_3] : memref<8x72xbf16, #tpu.memory_space<vmem>>, vector<8x72xbf16>
    %c0_4 = arith.constant 0 : index
    %c0_5 = arith.constant 0 : index
    %14 = vector.load %arg3[%c0_4, %c0_5] : memref<8x72xbf16, #tpu.memory_space<vmem>>, vector<8x72xbf16>
    %c0_i32_6 = arith.constant 0 : i32
    %15 = arith.index_cast %c0_i32_6 : i32 to index
    %c0_7 = arith.constant 0 : index
    %c0_8 = arith.constant 0 : index
    %16 = vector.load %arg1[%15, %c0_7, %c0_8] : memref<2x8x256xf32, #tpu.memory_space<vmem>>, vector<1x8x256xf32>
    %17 = vector.shape_cast %16 : vector<1x8x256xf32> to vector<8x256xf32>
    %c1_i32 = arith.constant 1 : i32
    %18 = tpu.dynamic_rotate %17 by %c1_i32 dim 1 : vector<8x256xf32>, i32 -> vector<8x256xf32>
    %c255_i32 = arith.constant 255 : i32
    %19 = tpu.dynamic_rotate %17 by %c255_i32 dim 1 : vector<8x256xf32>, i32 -> vector<8x256xf32>
    %20 = vector.shape_cast %6 : vector<1x256xi1> to vector<1x256xi1>
    %21 = vector.broadcast %20 : vector<1x256xi1> to vector<8x256xi1>
    %22 = arith.select %21, %19, %18 : vector<8x256xi1>, vector<8x256xf32>
    %23 = vector.shape_cast %8 : vector<1x256xi1> to vector<1x256xi1>
    %24 = vector.broadcast %23 : vector<1x256xi1> to vector<8x256xi1>
    %25 = arith.select %24, %18, %19 : vector<8x256xi1>, vector<8x256xf32>
    %c16_i32 = arith.constant 16 : i32
    %26 = tpu.dynamic_rotate %22 by %c16_i32 dim 1 : vector<8x256xf32>, i32 -> vector<8x256xf32>
    %c240_i32 = arith.constant 240 : i32
    %27 = tpu.dynamic_rotate %22 by %c240_i32 dim 1 : vector<8x256xf32>, i32 -> vector<8x256xf32>
    %28 = vector.shape_cast %10 : vector<1x256xi1> to vector<1x256xi1>
    %29 = vector.broadcast %28 : vector<1x256xi1> to vector<8x256xi1>
    %30 = arith.select %29, %27, %26 : vector<8x256xi1>, vector<8x256xf32>
    %31 = vector.shape_cast %12 : vector<1x256xi1> to vector<1x256xi1>
    %32 = vector.broadcast %31 : vector<1x256xi1> to vector<8x256xi1>
    %33 = arith.select %32, %26, %27 : vector<8x256xi1>, vector<8x256xf32>
    %c16_i32_9 = arith.constant 16 : i32
    %34 = tpu.dynamic_rotate %17 by %c16_i32_9 dim 1 : vector<8x256xf32>, i32 -> vector<8x256xf32>
    %c240_i32_10 = arith.constant 240 : i32
    %35 = tpu.dynamic_rotate %17 by %c240_i32_10 dim 1 : vector<8x256xf32>, i32 -> vector<8x256xf32>
    %36 = vector.shape_cast %10 : vector<1x256xi1> to vector<1x256xi1>
    %37 = vector.broadcast %36 : vector<1x256xi1> to vector<8x256xi1>
    %38 = arith.select %37, %35, %34 : vector<8x256xi1>, vector<8x256xf32>
    %39 = vector.shape_cast %12 : vector<1x256xi1> to vector<1x256xi1>
    %40 = vector.broadcast %39 : vector<1x256xi1> to vector<8x256xi1>
    %41 = arith.select %40, %34, %35 : vector<8x256xi1>, vector<8x256xf32>
    %c16_i32_11 = arith.constant 16 : i32
    %42 = tpu.dynamic_rotate %25 by %c16_i32_11 dim 1 : vector<8x256xf32>, i32 -> vector<8x256xf32>
    %c240_i32_12 = arith.constant 240 : i32
    %43 = tpu.dynamic_rotate %25 by %c240_i32_12 dim 1 : vector<8x256xf32>, i32 -> vector<8x256xf32>
    %44 = vector.shape_cast %10 : vector<1x256xi1> to vector<1x256xi1>
    %45 = vector.broadcast %44 : vector<1x256xi1> to vector<8x256xi1>
    %46 = arith.select %45, %43, %42 : vector<8x256xi1>, vector<8x256xf32>
    %47 = vector.shape_cast %12 : vector<1x256xi1> to vector<1x256xi1>
    %48 = vector.broadcast %47 : vector<1x256xi1> to vector<8x256xi1>
    %49 = arith.select %48, %42, %43 : vector<8x256xi1>, vector<8x256xf32>
    %50 = tpu.concatenate %30, %38, %46, %22, %17, %25, %33, %41, %49 in 0 : vector<8x256xf32>, vector<8x256xf32>, vector<8x256xf32>, vector<8x256xf32>, vector<8x256xf32>, vector<8x256xf32>, vector<8x256xf32>, vector<8x256xf32>, vector<8x256xf32> -> vector<72x256xf32>
    %51 = arith.truncf %50 : vector<72x256xf32> to vector<72x256xbf16>
    %cst = arith.constant dense<0.000000e+00> : vector<8x256xf32>
    %52 = tpu.matmul %13, %51, %cst {dimension_numbers = #tpu.dot_dimension_numbers<[1], [0], [0], [1], [0, 0, 1, 1], [], []>} : vector<8x72xbf16>, vector<72x256xbf16>, vector<8x256xf32> -> vector<8x256xf32>
    %cst_13 = arith.constant dense<0.000000e+00> : vector<8xf32>
    %53 = vector.multi_reduction <add>, %52, %cst_13 [1] : vector<8x256xf32> to vector<8xf32>
    %54 = vector.shape_cast %53 : vector<8xf32> to vector<8x1xf32>
    %55 = arith.mulf %52, %52 : vector<8x256xf32>
    %cst_14 = arith.constant dense<0.000000e+00> : vector<8xf32>
    %56 = vector.multi_reduction <add>, %55, %cst_14 [1] : vector<8x256xf32> to vector<8xf32>
    %57 = vector.shape_cast %56 : vector<8xf32> to vector<8x1xf32>
    %cst_15 = arith.constant 3.906250e-03 : f32
    %58 = vector.broadcast %cst_15 : f32 to vector<8x1xf32>
    %59 = arith.mulf %54, %58 : vector<8x1xf32>
    %cst_16 = arith.constant 3.906250e-03 : f32
    %60 = vector.broadcast %cst_16 : f32 to vector<8x1xf32>
    %61 = arith.mulf %57, %60 : vector<8x1xf32>
    %62 = arith.mulf %59, %59 : vector<8x1xf32>
    %63 = arith.subf %61, %62 : vector<8x1xf32>
    %cst_17 = arith.constant 0.000000e+00 : f32
    %64 = vector.broadcast %cst_17 : f32 to vector<8x1xf32>
    %65 = arith.maximumf %63, %64 : vector<8x1xf32>
    %66 = vector.broadcast %59 : vector<8x1xf32> to vector<8x256xf32>
    %67 = arith.subf %52, %66 : vector<8x256xf32>
    %cst_18 = arith.constant 9.99999974E-6 : f32
    %68 = vector.broadcast %cst_18 : f32 to vector<8x1xf32>
    %69 = arith.addf %65, %68 : vector<8x1xf32>
    %70 = math.rsqrt %69 : vector<8x1xf32>
    %71 = vector.broadcast %70 : vector<8x1xf32> to vector<8x256xf32>
    %72 = arith.mulf %67, %71 : vector<8x256xf32>
    %cst_19 = arith.constant 0.000000e+00 : f32
    %73 = vector.broadcast %cst_19 : f32 to vector<8x256xf32>
    %74 = arith.maximumf %72, %73 : vector<8x256xf32>
    %c1_i32_20 = arith.constant 1 : i32
    %75 = tpu.dynamic_rotate %74 by %c1_i32_20 dim 1 : vector<8x256xf32>, i32 -> vector<8x256xf32>
    %c255_i32_21 = arith.constant 255 : i32
    %76 = tpu.dynamic_rotate %74 by %c255_i32_21 dim 1 : vector<8x256xf32>, i32 -> vector<8x256xf32>
    %77 = vector.shape_cast %6 : vector<1x256xi1> to vector<1x256xi1>
    %78 = vector.broadcast %77 : vector<1x256xi1> to vector<8x256xi1>
    %79 = arith.select %78, %76, %75 : vector<8x256xi1>, vector<8x256xf32>
    %80 = vector.shape_cast %8 : vector<1x256xi1> to vector<1x256xi1>
    %81 = vector.broadcast %80 : vector<1x256xi1> to vector<8x256xi1>
    %82 = arith.select %81, %75, %76 : vector<8x256xi1>, vector<8x256xf32>
    %c16_i32_22 = arith.constant 16 : i32
    %83 = tpu.dynamic_rotate %79 by %c16_i32_22 dim 1 : vector<8x256xf32>, i32 -> vector<8x256xf32>
    %c240_i32_23 = arith.constant 240 : i32
    %84 = tpu.dynamic_rotate %79 by %c240_i32_23 dim 1 : vector<8x256xf32>, i32 -> vector<8x256xf32>
    %85 = vector.shape_cast %10 : vector<1x256xi1> to vector<1x256xi1>
    %86 = vector.broadcast %85 : vector<1x256xi1> to vector<8x256xi1>
    %87 = arith.select %86, %84, %83 : vector<8x256xi1>, vector<8x256xf32>
    %88 = vector.shape_cast %12 : vector<1x256xi1> to vector<1x256xi1>
    %89 = vector.broadcast %88 : vector<1x256xi1> to vector<8x256xi1>
    %90 = arith.select %89, %83, %84 : vector<8x256xi1>, vector<8x256xf32>
    %c16_i32_24 = arith.constant 16 : i32
    %91 = tpu.dynamic_rotate %74 by %c16_i32_24 dim 1 : vector<8x256xf32>, i32 -> vector<8x256xf32>
    %c240_i32_25 = arith.constant 240 : i32
    %92 = tpu.dynamic_rotate %74 by %c240_i32_25 dim 1 : vector<8x256xf32>, i32 -> vector<8x256xf32>
    %93 = vector.shape_cast %10 : vector<1x256xi1> to vector<1x256xi1>
    %94 = vector.broadcast %93 : vector<1x256xi1> to vector<8x256xi1>
    %95 = arith.select %94, %92, %91 : vector<8x256xi1>, vector<8x256xf32>
    %96 = vector.shape_cast %12 : vector<1x256xi1> to vector<1x256xi1>
    %97 = vector.broadcast %96 : vector<1x256xi1> to vector<8x256xi1>
    %98 = arith.select %97, %91, %92 : vector<8x256xi1>, vector<8x256xf32>
    %c16_i32_26 = arith.constant 16 : i32
    %99 = tpu.dynamic_rotate %82 by %c16_i32_26 dim 1 : vector<8x256xf32>, i32 -> vector<8x256xf32>
    %c240_i32_27 = arith.constant 240 : i32
    %100 = tpu.dynamic_rotate %82 by %c240_i32_27 dim 1 : vector<8x256xf32>, i32 -> vector<8x256xf32>
    %101 = vector.shape_cast %10 : vector<1x256xi1> to vector<1x256xi1>
    %102 = vector.broadcast %101 : vector<1x256xi1> to vector<8x256xi1>
    %103 = arith.select %102, %100, %99 : vector<8x256xi1>, vector<8x256xf32>
    %104 = vector.shape_cast %12 : vector<1x256xi1> to vector<1x256xi1>
    %105 = vector.broadcast %104 : vector<1x256xi1> to vector<8x256xi1>
    %106 = arith.select %105, %99, %100 : vector<8x256xi1>, vector<8x256xf32>
    %107 = tpu.concatenate %87, %95, %103, %79, %74, %82, %90, %98, %106 in 0 : vector<8x256xf32>, vector<8x256xf32>, vector<8x256xf32>, vector<8x256xf32>, vector<8x256xf32>, vector<8x256xf32>, vector<8x256xf32>, vector<8x256xf32>, vector<8x256xf32> -> vector<72x256xf32>
    %108 = arith.truncf %107 : vector<72x256xf32> to vector<72x256xbf16>
    %cst_28 = arith.constant dense<0.000000e+00> : vector<8x256xf32>
    %109 = tpu.matmul %14, %108, %cst_28 {dimension_numbers = #tpu.dot_dimension_numbers<[1], [0], [0], [1], [0, 0, 1, 1], [], []>} : vector<8x72xbf16>, vector<72x256xbf16>, vector<8x256xf32> -> vector<8x256xf32>
    %cst_29 = arith.constant dense<0.000000e+00> : vector<8xf32>
    %110 = vector.multi_reduction <add>, %109, %cst_29 [1] : vector<8x256xf32> to vector<8xf32>
    %111 = vector.shape_cast %110 : vector<8xf32> to vector<8x1xf32>
    %112 = arith.mulf %109, %109 : vector<8x256xf32>
    %cst_30 = arith.constant dense<0.000000e+00> : vector<8xf32>
    %113 = vector.multi_reduction <add>, %112, %cst_30 [1] : vector<8x256xf32> to vector<8xf32>
    %114 = vector.shape_cast %113 : vector<8xf32> to vector<8x1xf32>
    %cst_31 = arith.constant 3.906250e-03 : f32
    %115 = vector.broadcast %cst_31 : f32 to vector<8x1xf32>
    %116 = arith.mulf %111, %115 : vector<8x1xf32>
    %cst_32 = arith.constant 3.906250e-03 : f32
    %117 = vector.broadcast %cst_32 : f32 to vector<8x1xf32>
    %118 = arith.mulf %114, %117 : vector<8x1xf32>
    %119 = arith.mulf %116, %116 : vector<8x1xf32>
    %120 = arith.subf %118, %119 : vector<8x1xf32>
    %cst_33 = arith.constant 0.000000e+00 : f32
    %121 = vector.broadcast %cst_33 : f32 to vector<8x1xf32>
    %122 = arith.maximumf %120, %121 : vector<8x1xf32>
    %123 = vector.broadcast %116 : vector<8x1xf32> to vector<8x256xf32>
    %124 = arith.subf %109, %123 : vector<8x256xf32>
    %cst_34 = arith.constant 9.99999974E-6 : f32
    %125 = vector.broadcast %cst_34 : f32 to vector<8x1xf32>
    %126 = arith.addf %122, %125 : vector<8x1xf32>
    %127 = math.rsqrt %126 : vector<8x1xf32>
    %128 = vector.broadcast %127 : vector<8x1xf32> to vector<8x256xf32>
    %129 = arith.mulf %124, %128 : vector<8x256xf32>
    %130 = arith.addf %17, %129 : vector<8x256xf32>
    %131 = arith.index_cast %c0_i32_6 : i32 to index
    %c0_35 = arith.constant 0 : index
    %c0_36 = arith.constant 0 : index
    %132 = vector.load %arg4[%131, %c0_35, %c0_36] : memref<2x8x256xf32, #tpu.memory_space<vmem>>, vector<1x8x256xf32>
    %133 = vector.shape_cast %132 : vector<1x8x256xf32> to vector<8x256xf32>
    %134 = vector.shape_cast %130 : vector<8x256xf32> to vector<1x8x256xf32>
    tpu.vector_store %arg4[%131, %c0_35, %c0_36], %134 {strides = array<i32>} : memref<2x8x256xf32, #tpu.memory_space<vmem>>, vector<1x8x256xf32>,
    %c1_i32_37 = arith.constant 1 : i32
    %135 = arith.index_cast %c1_i32_37 : i32 to index
    %c0_38 = arith.constant 0 : index
    %c0_39 = arith.constant 0 : index
    %136 = vector.load %arg1[%135, %c0_38, %c0_39] : memref<2x8x256xf32, #tpu.memory_space<vmem>>, vector<1x8x256xf32>
    %137 = vector.shape_cast %136 : vector<1x8x256xf32> to vector<8x256xf32>
    %c1_i32_40 = arith.constant 1 : i32
    %138 = tpu.dynamic_rotate %137 by %c1_i32_40 dim 1 : vector<8x256xf32>, i32 -> vector<8x256xf32>
    %c255_i32_41 = arith.constant 255 : i32
    %139 = tpu.dynamic_rotate %137 by %c255_i32_41 dim 1 : vector<8x256xf32>, i32 -> vector<8x256xf32>
    %140 = vector.shape_cast %6 : vector<1x256xi1> to vector<1x256xi1>
    %141 = vector.broadcast %140 : vector<1x256xi1> to vector<8x256xi1>
    %142 = arith.select %141, %139, %138 : vector<8x256xi1>, vector<8x256xf32>
    %143 = vector.shape_cast %8 : vector<1x256xi1> to vector<1x256xi1>
    %144 = vector.broadcast %143 : vector<1x256xi1> to vector<8x256xi1>
    %145 = arith.select %144, %138, %139 : vector<8x256xi1>, vector<8x256xf32>
    %c16_i32_42 = arith.constant 16 : i32
    %146 = tpu.dynamic_rotate %142 by %c16_i32_42 dim 1 : vector<8x256xf32>, i32 -> vector<8x256xf32>
    %c240_i32_43 = arith.constant 240 : i32
    %147 = tpu.dynamic_rotate %142 by %c240_i32_43 dim 1 : vector<8x256xf32>, i32 -> vector<8x256xf32>
    %148 = vector.shape_cast %10 : vector<1x256xi1> to vector<1x256xi1>
    %149 = vector.broadcast %148 : vector<1x256xi1> to vector<8x256xi1>
    %150 = arith.select %149, %147, %146 : vector<8x256xi1>, vector<8x256xf32>
    %151 = vector.shape_cast %12 : vector<1x256xi1> to vector<1x256xi1>
    %152 = vector.broadcast %151 : vector<1x256xi1> to vector<8x256xi1>
    %153 = arith.select %152, %146, %147 : vector<8x256xi1>, vector<8x256xf32>
    %c16_i32_44 = arith.constant 16 : i32
    %154 = tpu.dynamic_rotate %137 by %c16_i32_44 dim 1 : vector<8x256xf32>, i32 -> vector<8x256xf32>
    %c240_i32_45 = arith.constant 240 : i32
    %155 = tpu.dynamic_rotate %137 by %c240_i32_45 dim 1 : vector<8x256xf32>, i32 -> vector<8x256xf32>
    %156 = vector.shape_cast %10 : vector<1x256xi1> to vector<1x256xi1>
    %157 = vector.broadcast %156 : vector<1x256xi1> to vector<8x256xi1>
    %158 = arith.select %157, %155, %154 : vector<8x256xi1>, vector<8x256xf32>
    %159 = vector.shape_cast %12 : vector<1x256xi1> to vector<1x256xi1>
    %160 = vector.broadcast %159 : vector<1x256xi1> to vector<8x256xi1>
    %161 = arith.select %160, %154, %155 : vector<8x256xi1>, vector<8x256xf32>
    %c16_i32_46 = arith.constant 16 : i32
    %162 = tpu.dynamic_rotate %145 by %c16_i32_46 dim 1 : vector<8x256xf32>, i32 -> vector<8x256xf32>
    %c240_i32_47 = arith.constant 240 : i32
    %163 = tpu.dynamic_rotate %145 by %c240_i32_47 dim 1 : vector<8x256xf32>, i32 -> vector<8x256xf32>
    %164 = vector.shape_cast %10 : vector<1x256xi1> to vector<1x256xi1>
    %165 = vector.broadcast %164 : vector<1x256xi1> to vector<8x256xi1>
    %166 = arith.select %165, %163, %162 : vector<8x256xi1>, vector<8x256xf32>
    %167 = vector.shape_cast %12 : vector<1x256xi1> to vector<1x256xi1>
    %168 = vector.broadcast %167 : vector<1x256xi1> to vector<8x256xi1>
    %169 = arith.select %168, %162, %163 : vector<8x256xi1>, vector<8x256xf32>
    %170 = tpu.concatenate %150, %158, %166, %142, %137, %145, %153, %161, %169 in 0 : vector<8x256xf32>, vector<8x256xf32>, vector<8x256xf32>, vector<8x256xf32>, vector<8x256xf32>, vector<8x256xf32>, vector<8x256xf32>, vector<8x256xf32>, vector<8x256xf32> -> vector<72x256xf32>
    %171 = arith.truncf %170 : vector<72x256xf32> to vector<72x256xbf16>
    %cst_48 = arith.constant dense<0.000000e+00> : vector<8x256xf32>
    %172 = tpu.matmul %13, %171, %cst_48 {dimension_numbers = #tpu.dot_dimension_numbers<[1], [0], [0], [1], [0, 0, 1, 1], [], []>} : vector<8x72xbf16>, vector<72x256xbf16>, vector<8x256xf32> -> vector<8x256xf32>
    %cst_49 = arith.constant dense<0.000000e+00> : vector<8xf32>
    %173 = vector.multi_reduction <add>, %172, %cst_49 [1] : vector<8x256xf32> to vector<8xf32>
    %174 = vector.shape_cast %173 : vector<8xf32> to vector<8x1xf32>
    %175 = arith.mulf %172, %172 : vector<8x256xf32>
    %cst_50 = arith.constant dense<0.000000e+00> : vector<8xf32>
    %176 = vector.multi_reduction <add>, %175, %cst_50 [1] : vector<8x256xf32> to vector<8xf32>
    %177 = vector.shape_cast %176 : vector<8xf32> to vector<8x1xf32>
    %cst_51 = arith.constant 3.906250e-03 : f32
    %178 = vector.broadcast %cst_51 : f32 to vector<8x1xf32>
    %179 = arith.mulf %174, %178 : vector<8x1xf32>
    %cst_52 = arith.constant 3.906250e-03 : f32
    %180 = vector.broadcast %cst_52 : f32 to vector<8x1xf32>
    %181 = arith.mulf %177, %180 : vector<8x1xf32>
    %182 = arith.mulf %179, %179 : vector<8x1xf32>
    %183 = arith.subf %181, %182 : vector<8x1xf32>
    %cst_53 = arith.constant 0.000000e+00 : f32
    %184 = vector.broadcast %cst_53 : f32 to vector<8x1xf32>
    %185 = arith.maximumf %183, %184 : vector<8x1xf32>
    %186 = vector.broadcast %179 : vector<8x1xf32> to vector<8x256xf32>
    %187 = arith.subf %172, %186 : vector<8x256xf32>
    %cst_54 = arith.constant 9.99999974E-6 : f32
    %188 = vector.broadcast %cst_54 : f32 to vector<8x1xf32>
    %189 = arith.addf %185, %188 : vector<8x1xf32>
    %190 = math.rsqrt %189 : vector<8x1xf32>
    %191 = vector.broadcast %190 : vector<8x1xf32> to vector<8x256xf32>
    %192 = arith.mulf %187, %191 : vector<8x256xf32>
    %cst_55 = arith.constant 0.000000e+00 : f32
    %193 = vector.broadcast %cst_55 : f32 to vector<8x256xf32>
    %194 = arith.maximumf %192, %193 : vector<8x256xf32>
    %c1_i32_56 = arith.constant 1 : i32
    %195 = tpu.dynamic_rotate %194 by %c1_i32_56 dim 1 : vector<8x256xf32>, i32 -> vector<8x256xf32>
    %c255_i32_57 = arith.constant 255 : i32
    %196 = tpu.dynamic_rotate %194 by %c255_i32_57 dim 1 : vector<8x256xf32>, i32 -> vector<8x256xf32>
    %197 = vector.shape_cast %6 : vector<1x256xi1> to vector<1x256xi1>
    %198 = vector.broadcast %197 : vector<1x256xi1> to vector<8x256xi1>
    %199 = arith.select %198, %196, %195 : vector<8x256xi1>, vector<8x256xf32>
    %200 = vector.shape_cast %8 : vector<1x256xi1> to vector<1x256xi1>
    %201 = vector.broadcast %200 : vector<1x256xi1> to vector<8x256xi1>
    %202 = arith.select %201, %195, %196 : vector<8x256xi1>, vector<8x256xf32>
    %c16_i32_58 = arith.constant 16 : i32
    %203 = tpu.dynamic_rotate %199 by %c16_i32_58 dim 1 : vector<8x256xf32>, i32 -> vector<8x256xf32>
    %c240_i32_59 = arith.constant 240 : i32
    %204 = tpu.dynamic_rotate %199 by %c240_i32_59 dim 1 : vector<8x256xf32>, i32 -> vector<8x256xf32>
    %205 = vector.shape_cast %10 : vector<1x256xi1> to vector<1x256xi1>
    %206 = vector.broadcast %205 : vector<1x256xi1> to vector<8x256xi1>
    %207 = arith.select %206, %204, %203 : vector<8x256xi1>, vector<8x256xf32>
    %208 = vector.shape_cast %12 : vector<1x256xi1> to vector<1x256xi1>
    %209 = vector.broadcast %208 : vector<1x256xi1> to vector<8x256xi1>
    %210 = arith.select %209, %203, %204 : vector<8x256xi1>, vector<8x256xf32>
    %c16_i32_60 = arith.constant 16 : i32
    %211 = tpu.dynamic_rotate %194 by %c16_i32_60 dim 1 : vector<8x256xf32>, i32 -> vector<8x256xf32>
    %c240_i32_61 = arith.constant 240 : i32
    %212 = tpu.dynamic_rotate %194 by %c240_i32_61 dim 1 : vector<8x256xf32>, i32 -> vector<8x256xf32>
    %213 = vector.shape_cast %10 : vector<1x256xi1> to vector<1x256xi1>
    %214 = vector.broadcast %213 : vector<1x256xi1> to vector<8x256xi1>
    %215 = arith.select %214, %212, %211 : vector<8x256xi1>, vector<8x256xf32>
    %216 = vector.shape_cast %12 : vector<1x256xi1> to vector<1x256xi1>
    %217 = vector.broadcast %216 : vector<1x256xi1> to vector<8x256xi1>
    %218 = arith.select %217, %211, %212 : vector<8x256xi1>, vector<8x256xf32>
    %c16_i32_62 = arith.constant 16 : i32
    %219 = tpu.dynamic_rotate %202 by %c16_i32_62 dim 1 : vector<8x256xf32>, i32 -> vector<8x256xf32>
    %c240_i32_63 = arith.constant 240 : i32
    %220 = tpu.dynamic_rotate %202 by %c240_i32_63 dim 1 : vector<8x256xf32>, i32 -> vector<8x256xf32>
    %221 = vector.shape_cast %10 : vector<1x256xi1> to vector<1x256xi1>
    %222 = vector.broadcast %221 : vector<1x256xi1> to vector<8x256xi1>
    %223 = arith.select %222, %220, %219 : vector<8x256xi1>, vector<8x256xf32>
    %224 = vector.shape_cast %12 : vector<1x256xi1> to vector<1x256xi1>
    %225 = vector.broadcast %224 : vector<1x256xi1> to vector<8x256xi1>
    %226 = arith.select %225, %219, %220 : vector<8x256xi1>, vector<8x256xf32>
    %227 = tpu.concatenate %207, %215, %223, %199, %194, %202, %210, %218, %226 in 0 : vector<8x256xf32>, vector<8x256xf32>, vector<8x256xf32>, vector<8x256xf32>, vector<8x256xf32>, vector<8x256xf32>, vector<8x256xf32>, vector<8x256xf32>, vector<8x256xf32> -> vector<72x256xf32>
    %228 = arith.truncf %227 : vector<72x256xf32> to vector<72x256xbf16>
    %cst_64 = arith.constant dense<0.000000e+00> : vector<8x256xf32>
    %229 = tpu.matmul %14, %228, %cst_64 {dimension_numbers = #tpu.dot_dimension_numbers<[1], [0], [0], [1], [0, 0, 1, 1], [], []>} : vector<8x72xbf16>, vector<72x256xbf16>, vector<8x256xf32> -> vector<8x256xf32>
    %cst_65 = arith.constant dense<0.000000e+00> : vector<8xf32>
    %230 = vector.multi_reduction <add>, %229, %cst_65 [1] : vector<8x256xf32> to vector<8xf32>
    %231 = vector.shape_cast %230 : vector<8xf32> to vector<8x1xf32>
    %232 = arith.mulf %229, %229 : vector<8x256xf32>
    %cst_66 = arith.constant dense<0.000000e+00> : vector<8xf32>
    %233 = vector.multi_reduction <add>, %232, %cst_66 [1] : vector<8x256xf32> to vector<8xf32>
    %234 = vector.shape_cast %233 : vector<8xf32> to vector<8x1xf32>
    %cst_67 = arith.constant 3.906250e-03 : f32
    %235 = vector.broadcast %cst_67 : f32 to vector<8x1xf32>
    %236 = arith.mulf %231, %235 : vector<8x1xf32>
    %cst_68 = arith.constant 3.906250e-03 : f32
    %237 = vector.broadcast %cst_68 : f32 to vector<8x1xf32>
    %238 = arith.mulf %234, %237 : vector<8x1xf32>
    %239 = arith.mulf %236, %236 : vector<8x1xf32>
    %240 = arith.subf %238, %239 : vector<8x1xf32>
    %cst_69 = arith.constant 0.000000e+00 : f32
    %241 = vector.broadcast %cst_69 : f32 to vector<8x1xf32>
    %242 = arith.maximumf %240, %241 : vector<8x1xf32>
    %243 = vector.broadcast %236 : vector<8x1xf32> to vector<8x256xf32>
    %244 = arith.subf %229, %243 : vector<8x256xf32>
    %cst_70 = arith.constant 9.99999974E-6 : f32
    %245 = vector.broadcast %cst_70 : f32 to vector<8x1xf32>
    %246 = arith.addf %242, %245 : vector<8x1xf32>
    %247 = math.rsqrt %246 : vector<8x1xf32>
    %248 = vector.broadcast %247 : vector<8x1xf32> to vector<8x256xf32>
    %249 = arith.mulf %244, %248 : vector<8x256xf32>
    %250 = arith.addf %137, %249 : vector<8x256xf32>
    %251 = arith.index_cast %c1_i32_37 : i32 to index
    %c0_71 = arith.constant 0 : index
    %c0_72 = arith.constant 0 : index
    %252 = vector.load %arg4[%251, %c0_71, %c0_72] : memref<2x8x256xf32, #tpu.memory_space<vmem>>, vector<1x8x256xf32>
    %253 = vector.shape_cast %252 : vector<1x8x256xf32> to vector<8x256xf32>
    %254 = vector.shape_cast %250 : vector<8x256xf32> to vector<1x8x256xf32>
    tpu.vector_store %arg4[%251, %c0_71, %c0_72], %254 {strides = array<i32>} : memref<2x8x256xf32, #tpu.memory_space<vmem>>, vector<1x8x256xf32>,
    %c2_i32 = arith.constant 2 : i32
    return
  }
  func.func @transform_0(%arg0: i32) -> (i32, i32, i32) {
    %c0_i32 = arith.constant 0 : i32
    %c0_i32_0 = arith.constant 0 : i32
    %c0_i32_1 = arith.constant 0 : i32
    %c0_i32_2 = arith.constant 0 : i32
    return %c0_i32, %c0_i32_0, %c0_i32_1 : i32, i32, i32
  }
  func.func @transform_1(%arg0: i32) -> (i32, i32) {
    %c0_i32 = arith.constant 0 : i32
    %c0_i32_0 = arith.constant 0 : i32
    %c0_i32_1 = arith.constant 0 : i32
    return %c0_i32, %c0_i32_0 : i32, i32
  }
  func.func @transform_2(%arg0: i32) -> (i32, i32) {
    %c0_i32 = arith.constant 0 : i32
    %c0_i32_0 = arith.constant 0 : i32
    %c0_i32_1 = arith.constant 0 : i32
    return %c0_i32, %c0_i32_0 : i32, i32
  }
  func.func @transform_3(%arg0: i32) -> (i32, i32, i32) {
    %c0_i32 = arith.constant 0 : i32
    %c0_i32_0 = arith.constant 0 : i32
    %c0_i32_1 = arith.constant 0 : i32
    %c0_i32_2 = arith.constant 0 : i32
    return %c0_i32, %c0_i32_0, %c0_i32_1 : i32, i32, i32
  }
}

</mosaic_0001>

<bundles_post_ra>
// kernel: tpu_custom_call.1
= control target key start
LH: loop header
LB: loop body
LE: loop exit
PB: predicated region body
PF: predicated region fallthrough
CT: control target
= control target key end

     0   :  { %8 = vsyncpa [#allocation3], 0  ;;  %s1487_s0 = inlined_call_operand.hbm [shape: f32[2,8,256], index: 0, kind: input, shape index: {}]   ;;  %s1488_s1 = inlined_call_operand.hbm [shape: bf16[8,72], index: 1, kind: input, shape index: {}]   ;;  %s1489_s2 = inlined_call_operand.vmem [shape: bf16[8,72], index: 2, kind: input, shape index: {}]   ;;  %s1490_s3 = inlined_call_operand.hbm [shape: f32[2,8,256], index: 3, kind: output, shape index: {}]  }
   0x1   :  { %9 = vsyncpa [#allocation6], 0 }
   0x2   :  { %10 = vsyncpa [#allocation4], 0  ;;  %s942_s12 = smov [#allocation2]   ;;  %s870_s16 = scalar_lea.hbm %s1487_s0, 512 }
   0x3   :  { %s16_s13 = sshll.u32 %s942_s12, 4  ;;  %p871_p0 = scmp.ne.s32.totalorder %s1487_s0, %s870_s16  ;;  %s17_s13 = int_to_ptr.vmem [resolvable:$true] %s16_s13 }
   0x4   :  { %p874_p1 = scmp.lt.u32.totalorder %s870_s16, %s1487_s0 }
   0x6   :  { %p876_p2 = pnand %p874_p1, %p871_p0 }
   0x8   :  { %879 = shalt.err (!%p876_p2)
}
   0x9   :  { %s880_s21 = scalar_lea.vmem %s17_s13, 512  ;;  %p885_p4 = scmp.lt.s32.totalorder %s17_s13, %s17_s13 }
   0xa   :  { %p881_p3 = scmp.ne.s32.totalorder %s17_s13, %s880_s21  ;;  %p886_p5 = scmp.lt.s32.totalorder %s880_s21, %s880_s21 }
   0xc   :  { %p887_p6 = por %p886_p5, %p885_p4 }
   0xe   :  { %p888_p7 = pnand %p887_p6, %p881_p3 }
  0x10   :  { %891 = shalt.err (!%p888_p7)
}
  0x11   :  { %s943_s22 = smov 256   ;;  %s944_s23 = smov 16  }
  0x12   :  { %22 = dma.hbm_to_vmem [thread:$0]  %s1487_s0, 512, %s17_s13, [#allocation3], %s943_s22, %s943_s22, %s944_s23  }
  0x13   :  { %s945_s26 = smov [#allocation5]   ;;  %s892_s30 = scalar_lea.hbm %s1488_s1, 64 }
  0x14   :  { %s29_s27 = sshll.u32 %s945_s26, 4  ;;  %p893_p8 = scmp.ne.s32.totalorder %s1488_s1, %s892_s30  ;;  %s30_s27 = int_to_ptr.vmem [resolvable:$true] %s29_s27 }
  0x15   :  { %p896_p9 = scmp.lt.u32.totalorder %s892_s30, %s1488_s1 }
  0x17   :  { %p898_p10 = pnand %p896_p9, %p893_p8 }
  0x19   :  { %901 = shalt.err (!%p898_p10)
}
  0x1a   :  { %s902_s8 = scalar_lea.vmem %s30_s27, 64  ;;  %p907_p12 = scmp.lt.s32.totalorder %s30_s27, %s30_s27 }
  0x1b   :  { %p903_p11 = scmp.ne.s32.totalorder %s30_s27, %s902_s8  ;;  %p908_p13 = scmp.lt.s32.totalorder %s902_s8, %s902_s8 }
  0x1d   :  { %p909_p0 = por %p908_p13, %p907_p12 }
  0x1f   :  { %p910_p1 = pnand %p909_p0, %p903_p11 }
  0x21   :  { %913 = shalt.err (!%p910_p1)
}
  0x22   :  { %32 = dma.hbm_to_vmem [thread:$0]  %s1488_s1, 64, %s30_s27, [#allocation6]  }
  0x23   :  { %936 = dma.done.wait [#allocation3], 512  }
  0x24   :  { %937 = vsyncadd [#allocation3], 4294966784 }
  0x25   :  { %938 = dma.done.wait [#allocation6], 64  }
  0x26   :  { %939 = vsyncadd [#allocation6], 4294967232  ;;  %v998_v0 = vld [vmem:[#allocation2] sm:$0xff]  ;;  %v1000_v1 = vld [vmem:[#allocation2 + $0x8] sm:$0xff]  ;;  %s946_s10 = smov 1   ;;  %s947_s1 = smov 127   ;;  %v42_v6 = vlaneseq }
  0x27   :  { %v1002_v2 = vld [vmem:[#allocation2 + $0x10] sm:$0xff]  ;;  %v700_v3 = vpack.i.bf16 %v1000_v1, %v998_v0  ;;  %v1006_v4 = vld [vmem:[#allocation2 + $0x18] sm:$0xff]  ;;  %s948_s11 = smov 112   ;;  %v949_v47 = vmov 0   ;;  %vm159_vm12 = vcmask 1043456   ;;  %vm155_vm13 = vcmask 588800  }
  0x28   :  { %v710_v5 = vpack.i.bf16 %v1006_v4, %v1002_v2  ;;  %v1016_v7 = vand.u32 127, %v42_v6  ;;  %198 = vmatprep.mubr.bf16.mxu0 %v949_v47  ;;  %343 = vmatprep.mubr.bf16.mxu1 %v949_v47 }
  0x29   :  { %701 = vrot.lane.b32.xlu0 %v700_v3, %s946_s10 }
  0x2a   :  { %711 = vrot.lane.b32.xlu1 %v710_v5, %s946_s10  ;;  %v1019_v8 = vadd.s32 128, %v1016_v7  ;;  %v45_v10 = vand.u32 15, %v1016_v7  ;;  %vm65_vm0 = vcmp.lt.s32.totalorder %v1016_v7, 1  ;;  %vm72_vm1 = vcmp.lt.s32.totalorder %v1016_v7, 127 }
  0x2b   :  { %v47_v51 = vshra.s32 %v1016_v7, 4  ;;  %vm91_vm6 = vcmp.lt.s32.totalorder %v1016_v7, 16  ;;  %vm98_vm7 = vcmp.lt.s32.totalorder %v1016_v7, 112 }
  0x2c   :  { %v46_v11 = vand.u32 15, %v1019_v8  ;;  %vm1025_vm2 = vcmp.eq.s32.totalorder %v45_v10, 0  ;;  %vm1033_vm4 = vcmp.eq.s32.totalorder %v45_v10, 15  ;;  %v48_v50 = vshra.s32 %v1019_v8, 4 }
  0x2d   :  { %706 = vrot.lane.b32.xlu0 %v700_v3, %s947_s1  ;;  %vm1117_vm9 = vcmp.eq.s32.totalorder %v47_v51, 0  ;;  %vm1176_vm11 = vcmp.eq.s32.totalorder %v47_v51, 15 }
  0x2e   :  { %716 = vrot.lane.b32.xlu1 %v710_v5, %s947_s1  ;;  %vm1029_vm3 = vcmp.eq.s32.totalorder %v46_v11, 0  ;;  %vm1037_vm5 = vcmp.eq.s32.totalorder %v46_v11, 15  ;;  %vm1113_vm8 = vcmp.eq.s32.totalorder %v48_v50, 0  ;;  %vm1166_vm10 = vcmp.eq.s32.totalorder %v48_v50, 15 }
  0x31   :  { %721 = vrot.lane.b32.xlu0 %v700_v3, %s944_s23 }
  0x32   :  { %726 = vrot.lane.b32.xlu1 %v700_v3, %s948_s11 }
  0x9b   :  { %v702_v9 = vpop.permute.xlu0 %701 }
  0x9c   :  { %v712_v12 = vpop.permute.xlu1 %711  ;;  %v704_v13 = vunpack.i.h.bf16 %v702_v9  ;;  %v703_v14 = vunpack.i.l.bf16 %v702_v9 }
  0x9d   :  { %v714_v29 = vunpack.i.h.bf16 %v712_v12  ;;  %v713_v30 = vunpack.i.l.bf16 %v712_v12 }
  0x9e   :  { %v66_v23 = vsel %vm65_vm0, %v703_v14, %v704_v13  ;;  %v67_v24 = vsel %vm65_vm0, %v704_v13, %v703_v14 }
  0x9f   :  { %v707_v15 = vpop.permute.xlu0 %706  ;;  %v382_v36 = vsel %vm65_vm0, %v713_v30, %v714_v29  ;;  %v383_v37 = vsel %vm65_vm0, %v714_v29, %v713_v30 }
  0xa0   :  { %v709_v16 = vunpack.i.h.bf16 %v707_v15  ;;  %v708_v17 = vunpack.i.l.bf16 %v707_v15  ;;  %v717_v22 = vpop.permute.xlu1 %716 }
  0xa1   :  { %v719_v32 = vunpack.i.h.bf16 %v717_v22  ;;  %v718_v33 = vunpack.i.l.bf16 %v717_v22 }
  0xa2   :  { %v73_v25 = vsel %vm72_vm1, %v708_v17, %v709_v16  ;;  %v74_v26 = vsel %vm72_vm1, %v709_v16, %v708_v17 }
  0xa3   :  { %v1051_v27 = vsel %vm1025_vm2, %v73_v25, %v67_v24  ;;  %v1055_v28 = vsel %vm1029_vm3, %v74_v26, %v66_v23  ;;  %v1061_v34 = vsel %vm1033_vm4, %v67_v24, %v73_v25  ;;  %v1065_v35 = vsel %vm1037_vm5, %v66_v23, %v74_v26  ;;  %v722_v49 = vpop.permute.xlu0 %721 }
  0xa4   :  { %v735_v31 = vpack.i.bf16 %v1055_v28, %v1051_v27  ;;  %v745_v38 = vpack.i.bf16 %v1065_v35, %v1061_v34  ;;  %v388_v39 = vsel %vm72_vm1, %v718_v33, %v719_v32  ;;  %v389_v40 = vsel %vm72_vm1, %v719_v32, %v718_v33  ;;  %v727_v48 = vpop.permute.xlu1 %726 }
  0xa5   :  { %v1083_v41 = vsel %vm1025_vm2, %v388_v39, %v383_v37  ;;  %v1087_v42 = vsel %vm1029_vm3, %v389_v40, %v382_v36  ;;  %v1095_v44 = vsel %vm1033_vm4, %v383_v37, %v388_v39  ;;  %v1099_v45 = vsel %vm1037_vm5, %v382_v36, %v389_v40 }
  0xa6   :  { %736 = vrot.lane.b32.xlu1 %v735_v31, %s948_s11  ;;  %731 = vrot.lane.b32.xlu0 %v735_v31, %s944_s23  ;;  %v765_v43 = vpack.i.bf16 %v1087_v42, %v1083_v41  ;;  %v775_v46 = vpack.i.bf16 %v1099_v45, %v1095_v44  ;;  %v729_v52 = vunpack.i.h.bf16 %v727_v48  ;;  %v728_v53 = vunpack.i.l.bf16 %v727_v48 }
  0xa7   :  { %v724_v54 = vunpack.i.h.bf16 %v722_v49  ;;  %v723_v55 = vunpack.i.l.bf16 %v722_v49  ;;  %v150_v49 = vpack.c.bf16 %v1065_v35, %v1000_v1  ;;  %v149_v35 = vpack.c.bf16 %v1061_v34, %v998_v0 }
  0xa8   :  { %v124_v61 = vsel %vm98_vm7, %v729_v52, %v728_v53  ;;  %v1131_v63 = vsel %vm98_vm7, %v728_v53, %v729_v52 }
  0xa9   :  { %v117_v60 = vsel %vm91_vm6, %v723_v55, %v724_v54  ;;  %v1127_v62 = vsel %vm91_vm6, %v724_v54, %v723_v55 }
  0xaa   :  { %746 = vrot.lane.b32.xlu1 %v745_v38, %s948_s11  ;;  %741 = vrot.lane.b32.xlu0 %v745_v38, %s944_s23  ;;  %v126_v16 = vsel %vm1113_vm8, %v124_v61, %v117_v60  ;;  %v125_v22 = vsel %vm1117_vm9, %v1131_v63, %v1127_v62  ;;  %v128_v51 = vsel %vm1166_vm10, %v117_v60, %v124_v61 }
  0xae   :  { %756 = vrot.lane.b32.xlu1 %v710_v5, %s948_s11  ;;  %751 = vrot.lane.b32.xlu0 %v710_v5, %s944_s23 }
  0xb2   :  { %766 = vrot.lane.b32.xlu1 %v765_v43, %s948_s11  ;;  %761 = vrot.lane.b32.xlu0 %v765_v43, %s944_s23 }
  0xb6   :  { %776 = vrot.lane.b32.xlu1 %v775_v46, %s948_s11  ;;  %771 = vrot.lane.b32.xlu0 %v775_v46, %s944_s23 }
 0x118   :  { %v737_v58 = vpop.permute.xlu1 %736  ;;  %v732_v59 = vpop.permute.xlu0 %731 }
 0x119   :  { %v739_v3 = vunpack.i.h.bf16 %v737_v58  ;;  %v738_v5 = vunpack.i.l.bf16 %v737_v58  ;;  %v734_v6 = vunpack.i.h.bf16 %v732_v59  ;;  %v733_v8 = vunpack.i.l.bf16 %v732_v59 }
 0x11b   :  { %v92_v9 = vsel %vm91_vm6, %v733_v8, %v734_v6  ;;  %v100_v10 = vsel %vm98_vm7, %v739_v3, %v738_v5  ;;  %v1139_v11 = vsel %vm91_vm6, %v734_v6, %v733_v8  ;;  %v99_v12 = vsel %vm98_vm7, %v738_v5, %v739_v3 }
 0x11c   :  { %v747_v13 = vpop.permute.xlu1 %746  ;;  %v742_v14 = vpop.permute.xlu0 %741  ;;  %v106_v15 = vsel %vm1113_vm8, %v100_v10, %v92_v9  ;;  %v105_v17 = vsel %vm1117_vm9, %v99_v12, %v1139_v11  ;;  %v112_v52 = vsel %vm1166_vm10, %v92_v9, %v100_v10  ;;  %v127_v8 = vsel %vm1176_vm11, %v1127_v62, %v1131_v63 }
 0x11d   :  { %v749_v23 = vunpack.i.h.bf16 %v747_v13  ;;  %v748_v24 = vunpack.i.l.bf16 %v747_v13  ;;  %v744_v25 = vunpack.i.h.bf16 %v742_v14  ;;  %v743_v26 = vunpack.i.l.bf16 %v742_v14 }
 0x11e   :  { %v146_v29 = vpack.c.bf16 %v126_v16, %v106_v15  ;;  %v145_v30 = vpack.c.bf16 %v125_v22, %v105_v17  ;;  %v152_v13 = vpack.c.bf16 %v128_v51, %v112_v52  ;;  %v111_v14 = vsel %vm1176_vm11, %v1139_v11, %v99_v12 }
 0x11f   :  { %v139_v31 = vsel %vm98_vm7, %v748_v24, %v749_v23  ;;  %v140_v32 = vsel %vm98_vm7, %v749_v23, %v748_v24  ;;  %v133_v33 = vsel %vm91_vm6, %v743_v26, %v744_v25  ;;  %v134_v36 = vsel %vm91_vm6, %v744_v25, %v743_v26 }
 0x120   :  { %166 = vmatprep.subr.bf16.mxu0 %v146_v29  ;;  %v757_v37 = vpop.permute.xlu1 %756  ;;  %v752_v38 = vpop.permute.xlu0 %751  ;;  %v142_v39 = vsel %vm1113_vm8, %v140_v32, %v133_v33  ;;  %v141_v40 = vsel %vm1117_vm9, %v139_v31, %v134_v36  ;;  %v144_v15 = vsel %vm1166_vm10, %v133_v33, %v140_v32  ;;  %v143_v34 = vsel %vm1176_vm11, %v134_v36, %v139_v31 }
 0x121   :  { %167 = vmatpush1.bf16.msra.mxu0 %v145_v30  ;;  %v148_v46 = vpack.c.bf16 %v1055_v28, %v142_v39  ;;  %v147_v48 = vpack.c.bf16 %v1051_v27, %v141_v40  ;;  %v759_v54 = vunpack.i.h.bf16 %v757_v37  ;;  %v758_v55 = vunpack.i.l.bf16 %v757_v37 }
 0x122   :  { %v754_v50 = vunpack.i.h.bf16 %v752_v38  ;;  %v753_v58 = vunpack.i.l.bf16 %v752_v38  ;;  %v151_v22 = vpack.c.bf16 %v127_v8, %v111_v14  ;;  %v154_v25 = vpack.c.bf16 %v144_v15, %v144_v15 }
 0x123   :  { %168 = vmatprep.subr.bf16.mxu0 %v148_v46  ;;  %v421_v60 = vsel %vm98_vm7, %v759_v54, %v758_v55  ;;  %v420_v23 = vsel %vm98_vm7, %v758_v55, %v759_v54  ;;  %v153_v26 = vpack.c.bf16 %v143_v34, %v143_v34 }
 0x124   :  { %v767_v59 = vpop.permute.xlu1 %766  ;;  %v762_v3 = vpop.permute.xlu0 %761  ;;  %v414_v61 = vsel %vm91_vm6, %v753_v58, %v754_v50  ;;  %v415_v24 = vsel %vm91_vm6, %v754_v50, %v753_v58 }
 0x125   :  { %v769_v28 = vunpack.i.h.bf16 %v767_v59  ;;  %v768_v5 = vunpack.i.l.bf16 %v767_v59  ;;  %v764_v27 = vunpack.i.h.bf16 %v762_v3  ;;  %v763_v6 = vunpack.i.l.bf16 %v762_v3  ;;  %169 = vmatpush1.bf16.msra.mxu0 %v147_v48 }
 0x126   :  { %170 = vmatprep.subr.bf16.mxu0 %v150_v49  ;;  %v423_v32 = vsel %vm1113_vm8, %v421_v60, %v414_v61  ;;  %v161_v37 = vsel %vm159_vm12, %v153_v26, 0  ;;  %v422_v40 = vsel %vm1117_vm9, %v420_v23, %v415_v24  ;;  %v57_v49 = vld [vmem:[#allocation5] sm:$0xf]  ;;  %v447_v59 = vpack.c.bf16 %v1099_v45, %v1006_v4 }
 0x127   :  { %v405_v62 = vsel %vm98_vm7, %v769_v28, %v768_v5  ;;  %v398_v63 = vsel %vm91_vm6, %v763_v6, %v764_v27  ;;  %v404_v29 = vsel %vm98_vm7, %v768_v5, %v769_v28  ;;  %v399_v30 = vsel %vm91_vm6, %v764_v27, %v763_v6 }
 0x128   :  { %v777_v9 = vpop.permute.xlu1 %776  ;;  %v772_v10 = vpop.permute.xlu0 %771  ;;  %v407_v31 = vsel %vm1113_vm8, %v405_v62, %v398_v63  ;;  %v406_v39 = vsel %vm1117_vm9, %v404_v29, %v399_v30  ;;  %v409_v3 = vsel %vm1166_vm10, %v398_v63, %v405_v62  ;;  %v425_v28 = vsel %vm1166_vm10, %v414_v61, %v421_v60 }
 0x129   :  { %171 = vmatpush1.bf16.msra.mxu0 %v149_v35  ;;  %v779_v11 = vunpack.i.h.bf16 %v777_v9  ;;  %v778_v12 = vunpack.i.l.bf16 %v777_v9  ;;  %v774_v16 = vunpack.i.h.bf16 %v772_v10  ;;  %v773_v17 = vunpack.i.l.bf16 %v772_v10 }
 0x12a   :  { %172 = vmatprep.subr.bf16.mxu0 %v152_v13  ;;  %v443_v38 = vpack.c.bf16 %v423_v32, %v407_v31  ;;  %v442_v54 = vpack.c.bf16 %v422_v40, %v406_v39  ;;  %v449_v5 = vpack.c.bf16 %v425_v28, %v409_v3  ;;  %v408_v27 = vsel %vm1176_vm11, %v399_v30, %v404_v29 }
 0x12b   :  { %v437_v33 = vsel %vm98_vm7, %v779_v11, %v778_v12  ;;  %v430_v36 = vsel %vm91_vm6, %v773_v17, %v774_v16  ;;  %v436_v46 = vsel %vm98_vm7, %v778_v12, %v779_v11  ;;  %v431_v48 = vsel %vm91_vm6, %v774_v16, %v773_v17 }
 0x12c   :  { %v439_v52 = vsel %vm1113_vm8, %v437_v33, %v430_v36  ;;  %v438_v50 = vsel %vm1117_vm9, %v436_v46, %v431_v48  ;;  %v441_v4 = vsel %vm1166_vm10, %v430_v36, %v437_v33  ;;  %v440_v45 = vsel %vm1176_vm11, %v431_v48, %v436_v46 }
 0x12d   :  { %173 = vmatpush1.bf16.msra.mxu0 %v151_v22  ;;  %v445_v55 = vpack.c.bf16 %v1087_v42, %v439_v52  ;;  %v444_v58 = vpack.c.bf16 %v1083_v41, %v438_v50  ;;  %v446_v42 = vpack.c.bf16 %v1095_v44, %v1002_v2  ;;  %v424_v41 = vsel %vm1176_vm11, %v415_v24, %v420_v23 }
 0x12e   :  { %683 = vmatprep.subr.msk.bf16.mxu0 %vm159_vm12, %v154_v25  ;;  %v448_v6 = vpack.c.bf16 %v424_v41, %v408_v27  ;;  %v451_v35 = vpack.c.bf16 %v441_v4, %v441_v4  ;;  %v450_v51 = vpack.c.bf16 %v440_v45, %v440_v45 }
 0x130   :  { %v453_v2 = vsel %vm159_vm12, %v450_v51, 0 }
 0x131   :  { %175 = vmatpush1.bf16.msra.mxu0 %v161_v37 }
 0x132   :  { %458 = vmatprep.subr.bf16.mxu0 %v443_v38 }
 0x134   :  { %684 = vmatmul.mubr.msk.bf16.vlgmr.msra.gmra.mrb[0].mxu0 %vm155_vm13, %v57_v49 }
 0x135   :  { %459 = vmatpush1.bf16.msra.mxu0 %v442_v54  ;;  %490 = vmatprep.mubr.bf16.mxu0 %v949_v47 }
 0x136   :  { %460 = vmatprep.subr.bf16.mxu0 %v445_v55 }
 0x139   :  { %461 = vmatpush1.bf16.msra.mxu0 %v444_v58 }
 0x13a   :  { %462 = vmatprep.subr.bf16.mxu0 %v447_v59 }
 0x13d   :  { %463 = vmatpush1.bf16.msra.mxu0 %v446_v42 }
 0x13e   :  { %464 = vmatprep.subr.bf16.mxu0 %v449_v5 }
 0x141   :  { %465 = vmatpush1.bf16.msra.mxu0 %v448_v6 }
 0x142   :  { %687 = vmatprep.subr.msk.bf16.mxu0 %vm159_vm12, %v451_v35 }
 0x145   :  { %467 = vmatpush1.bf16.msra.mxu0 %v453_v2 }
 0x148   :  { %688 = vmatmul.mubr.msk.bf16.vlgmr.msra.gmra.mrb[4].mxu0 %vm155_vm13, %v57_v49 }
 0x207   :  { %v200_v44 = vpop.f32.mrb[0].mxu0 }
 0x208   :  { %v202_v8 = vpop.f32.mrb[1].mxu0  ;;  %v210_v9 = vmul.f32 %v200_v44, %v200_v44 }
 0x209   :  { %v204_v10 = vpop.f32.mrb[2].mxu0  ;;  %v207_v13 = vadd.f32 %v202_v8, %v200_v44  ;;  %v211_v14 = vmul.f32 %v202_v8, %v202_v8 }
 0x20a   :  { %v205_v15 = vpop.f32.mrb[3].mxu0 }
 0x20b   :  { %208 = vadd.xlane.f32.xlu0 %v207_v13  ;;  %v212_v34 = vadd.f32 %v211_v14, %v210_v9 }
 0x20d   :  { %213 = vadd.xlane.f32.xlu1 %v212_v34 }
 0x21b   :  { %v492_v60 = vpop.f32.mrb[4].mxu0 }
 0x21c   :  { %v494_v61 = vpop.f32.mrb[5].mxu0  ;;  %v502_v62 = vmul.f32 %v492_v60, %v492_v60 }
 0x21d   :  { %v496_v63 = vpop.f32.mrb[6].mxu0  ;;  %v499_v11 = vadd.f32 %v494_v61, %v492_v60  ;;  %v503_v12 = vmul.f32 %v494_v61, %v494_v61 }
 0x21e   :  { %v497_v16 = vpop.f32.mrb[7].mxu0 }
 0x21f   :  { %500 = vadd.xlane.f32.xlu0 %v499_v11  ;;  %v504_v17 = vadd.f32 %v503_v12, %v502_v62 }
 0x223   :  { %505 = vadd.xlane.f32.xlu0 %v504_v17 }
 0x298   :  { %v209_v22 = vpop.xlane.xlu0 %208 }
 0x299   :  { %v215_v23 = vmul.f32 0.00390625, %v209_v22 }
 0x29a   :  { %v214_v24 = vpop.xlane.xlu1 %213 }
 0x29b   :  { %v216_v25 = vmul.f32 0.00390625, %v214_v24  ;;  %v217_v26 = vmul.f32 %v215_v23, %v215_v23  ;;  %v220_v32 = vsub.f32 %v200_v44, %v215_v23  ;;  %v221_v33 = vsub.f32 %v202_v8, %v215_v23 }
 0x29d   :  { %v218_v29 = vsub.f32 %v216_v25, %v217_v26 }
 0x29f   :  { %v219_v30 = vmax.f32 %v218_v29, 0.0 }
 0x2a1   :  { %v222_v31 = vadd.f32 1e-05, %v219_v30 }
 0x2a3   :  { %860 = vrsqrt.f32 %v222_v31 }
 0x2ac   :  { %v501_v36 = vpop.xlane.xlu0 %500 }
 0x2ad   :  { %v861_v37 = vpop.eup %860  ;;  %v507_v38 = vmul.f32 0.00390625, %v501_v36 }
 0x2ae   :  { %v1256_v39 = vmul.f32 %v861_v37, %v220_v32  ;;  %v1258_v40 = vmul.f32 %v861_v37, %v221_v33 }
 0x2af   :  { %v509_v52 = vmul.f32 %v507_v38, %v507_v38  ;;  %v512_v3 = vsub.f32 %v492_v60, %v507_v38  ;;  %v513_v28 = vsub.f32 %v494_v61, %v507_v38 }
 0x2b0   :  { %v226_v46 = vmax.f32 %v1256_v39, 0.0  ;;  %v227_v48 = vmax.f32 %v1258_v40, 0.0  ;;  %v506_v49 = vpop.xlane.xlu0 %505 }
 0x2b1   :  { %v508_v54 = vmul.f32 0.00390625, %v506_v49 }
 0x2b2   :  { %v780_v55 = vpack.i.bf16 %v227_v48, %v226_v46 }
 0x2b3   :  { %v510_v50 = vsub.f32 %v508_v54, %v509_v52 }
 0x2b4   :  { %781 = vrot.lane.b32.xlu1 %v780_v55, %s946_s10  ;;  %786 = vrot.lane.b32.xlu0 %v780_v55, %s947_s1 }
 0x2b5   :  { %v511_v58 = vmax.f32 %v510_v50, 0.0 }
 0x2b7   :  { %v514_v59 = vadd.f32 1e-05, %v511_v58 }
 0x2b8   :  { %801 = vrot.lane.b32.xlu0 %v780_v55, %s944_s23 }
 0x2b9   :  { %862 = vrsqrt.f32 %v514_v59 }
 0x2c3   :  { %v863_v42 = vpop.eup %862 }
 0x2c4   :  { %v1269_v5 = vmul.f32 %v863_v42, %v512_v3  ;;  %v1271_v27 = vmul.f32 %v863_v42, %v513_v28 }
 0x2c6   :  { %v518_v41 = vmax.f32 %v1269_v5, 0.0  ;;  %v519_v4 = vmax.f32 %v1271_v27, 0.0 }
 0x2c8   :  { %v790_v45 = vpack.i.bf16 %v519_v4, %v518_v41 }
 0x2ca   :  { %791 = vrot.lane.b32.xlu1 %v790_v45, %s946_s10 }
 0x2ce   :  { %796 = vrot.lane.b32.xlu1 %v790_v45, %s947_s1 }
 0x2d2   :  { %806 = vrot.lane.b32.xlu1 %v780_v55, %s948_s11 }
 0x326   :  { %v782_v6 = vpop.permute.xlu1 %781  ;;  %v787_v35 = vpop.permute.xlu0 %786 }
 0x327   :  { %v784_v51 = vunpack.i.h.bf16 %v782_v6  ;;  %v783_v2 = vunpack.i.l.bf16 %v782_v6  ;;  %v789_v44 = vunpack.i.h.bf16 %v787_v35  ;;  %v788_v8 = vunpack.i.l.bf16 %v787_v35 }
 0x329   :  { %v232_v9 = vsel %vm65_vm0, %v783_v2, %v784_v51  ;;  %v233_v10 = vsel %vm65_vm0, %v784_v51, %v783_v2  ;;  %v238_v13 = vsel %vm72_vm1, %v788_v8, %v789_v44  ;;  %v239_v14 = vsel %vm72_vm1, %v789_v44, %v788_v8 }
 0x32a   :  { %v1292_v15 = vsel %vm1025_vm2, %v238_v13, %v233_v10  ;;  %v1296_v34 = vsel %vm1029_vm3, %v239_v14, %v232_v9  ;;  %v1302_v61 = vsel %vm1033_vm4, %v233_v10, %v238_v13  ;;  %v1306_v62 = vsel %vm1037_vm5, %v232_v9, %v239_v14  ;;  %v802_v37 = vpop.permute.xlu0 %801 }
 0x32b   :  { %v815_v60 = vpack.i.bf16 %v1296_v34, %v1292_v15  ;;  %v825_v63 = vpack.i.bf16 %v1306_v62, %v1302_v61  ;;  %v804_v49 = vunpack.i.h.bf16 %v802_v37  ;;  %v803_v52 = vunpack.i.l.bf16 %v802_v37 }
 0x32d   :  { %816 = vrot.lane.b32.xlu1 %v815_v60, %s948_s11  ;;  %811 = vrot.lane.b32.xlu0 %v815_v60, %s944_s23  ;;  %v264_v42 = vsel %vm91_vm6, %v803_v52, %v804_v49 }
 0x331   :  { %826 = vrot.lane.b32.xlu1 %v825_v63, %s948_s11  ;;  %821 = vrot.lane.b32.xlu0 %v825_v63, %s944_s23 }
 0x335   :  { %836 = vrot.lane.b32.xlu1 %v790_v45, %s948_s11  ;;  %831 = vrot.lane.b32.xlu0 %v790_v45, %s944_s23  ;;  %v265_v45 = vsel %vm91_vm6, %v804_v49, %v803_v52 }
 0x33c   :  { %v792_v11 = vpop.permute.xlu1 %791 }
 0x33d   :  { %v794_v12 = vunpack.i.h.bf16 %v792_v11  ;;  %v793_v16 = vunpack.i.l.bf16 %v792_v11 }
 0x33f   :  { %v524_v24 = vsel %vm65_vm0, %v793_v16, %v794_v12  ;;  %v525_v25 = vsel %vm65_vm0, %v794_v12, %v793_v16 }
 0x340   :  { %v797_v17 = vpop.permute.xlu1 %796 }
 0x341   :  { %v799_v22 = vunpack.i.h.bf16 %v797_v17  ;;  %v798_v23 = vunpack.i.l.bf16 %v797_v17 }
 0x343   :  { %v530_v26 = vsel %vm72_vm1, %v798_v23, %v799_v22  ;;  %v531_v29 = vsel %vm72_vm1, %v799_v22, %v798_v23 }
 0x344   :  { %v1326_v30 = vsel %vm1025_vm2, %v530_v26, %v525_v25  ;;  %v1330_v31 = vsel %vm1029_vm3, %v531_v29, %v524_v24  ;;  %v1336_v33 = vsel %vm1033_vm4, %v525_v25, %v530_v26  ;;  %v1340_v36 = vsel %vm1037_vm5, %v524_v24, %v531_v29  ;;  %v807_v19 = vpop.permute.xlu1 %806 }
 0x345   :  { %v845_v32 = vpack.i.bf16 %v1330_v31, %v1326_v30  ;;  %v855_v18 = vpack.i.bf16 %v1340_v36, %v1336_v33  ;;  %v809_v20 = vunpack.i.h.bf16 %v807_v19  ;;  %v808_v38 = vunpack.i.l.bf16 %v807_v19 }
 0x346   :  { %v297_v19 = vpack.c.bf16 %v1306_v62, %v227_v48  ;;  %v588_v56 = vpack.c.bf16 %v1336_v33, %v518_v41 }
 0x347   :  { %846 = vrot.lane.b32.xlu1 %v845_v32, %s948_s11  ;;  %841 = vrot.lane.b32.xlu0 %v845_v32, %s944_s23  ;;  %v271_v55 = vsel %vm98_vm7, %v809_v20, %v808_v38  ;;  %v270_v50 = vsel %vm98_vm7, %v808_v38, %v809_v20  ;;  %v296_v20 = vpack.c.bf16 %v1302_v61, %v226_v46 }
 0x348   :  { %v273_v10 = vsel %vm1113_vm8, %v271_v55, %v264_v42  ;;  %v272_v14 = vsel %vm1117_vm9, %v270_v50, %v265_v45  ;;  %v275_v38 = vsel %vm1166_vm10, %v264_v42, %v271_v55  ;;  %v274_v39 = vsel %vm1176_vm11, %v265_v45, %v270_v50 }
 0x34b   :  { %856 = vrot.lane.b32.xlu1 %v855_v18, %s948_s11  ;;  %851 = vrot.lane.b32.xlu0 %v855_v18, %s944_s23 }
 0x39f   :  { %v817_v21 = vpop.permute.xlu1 %816  ;;  %v812_v54 = vpop.permute.xlu0 %811 }
 0x3a0   :  { %v819_v58 = vunpack.i.h.bf16 %v817_v21  ;;  %v818_v59 = vunpack.i.l.bf16 %v817_v21  ;;  %v814_v3 = vunpack.i.h.bf16 %v812_v54  ;;  %v813_v28 = vunpack.i.l.bf16 %v812_v54 }
 0x3a2   :  { %v248_v6 = vsel %vm91_vm6, %v813_v28, %v814_v3  ;;  %v255_v35 = vsel %vm98_vm7, %v819_v58, %v818_v59  ;;  %v249_v51 = vsel %vm91_vm6, %v814_v3, %v813_v28  ;;  %v254_v2 = vsel %vm98_vm7, %v818_v59, %v819_v58  ;;  %v58_v3 = vld [vmem:[%s1489_s2] sm:$0xf]  ;;  %s950_s2 = smov [#allocation7]  }
 0x3a3   :  { %v827_v44 = vpop.permute.xlu1 %826  ;;  %v822_v8 = vpop.permute.xlu0 %821  ;;  %v257_v9 = vsel %vm1113_vm8, %v255_v35, %v248_v6  ;;  %v256_v13 = vsel %vm1117_vm9, %v254_v2, %v249_v51  ;;  %v259_v37 = vsel %vm1166_vm10, %v248_v6, %v255_v35  ;;  %s670_s14 = sshll.u32 %s950_s2, 4  ;;  %s671_s14 = int_to_ptr.vmem [resolvable:$true] %s670_s14 }
 0x3a4   :  { %v829_v60 = vunpack.i.h.bf16 %v827_v44  ;;  %v828_v63 = vunpack.i.l.bf16 %v827_v44  ;;  %v824_v11 = vunpack.i.h.bf16 %v822_v8  ;;  %v823_v12 = vunpack.i.l.bf16 %v822_v8  ;;  %s914_s15 = scalar_lea.vmem %s671_s14, 512  ;;  %p919_p3 = scmp.lt.s32.totalorder %s671_s14, %s671_s14 }
 0x3a5   :  { %v293_v16 = vpack.c.bf16 %v273_v10, %v257_v9  ;;  %v292_v17 = vpack.c.bf16 %v272_v14, %v256_v13  ;;  %p915_p2 = scmp.ne.s32.totalorder %s671_s14, %s914_s15  ;;  %p920_p4 = scmp.lt.s32.totalorder %s914_s15, %s914_s15 }
 0x3a6   :  { %v286_v22 = vsel %vm98_vm7, %v828_v63, %v829_v60  ;;  %v287_v23 = vsel %vm98_vm7, %v829_v60, %v828_v63  ;;  %v280_v24 = vsel %vm91_vm6, %v823_v12, %v824_v11  ;;  %v281_v25 = vsel %vm91_vm6, %v824_v11, %v823_v12 }
 0x3a7   :  { %311 = vmatprep.subr.bf16.mxu1 %v293_v16  ;;  %v289_v26 = vsel %vm1113_vm8, %v287_v23, %v280_v24  ;;  %v288_v29 = vsel %vm1117_vm9, %v286_v22, %v281_v25  ;;  %v291_v40 = vsel %vm1166_vm10, %v280_v24, %v287_v23  ;;  %v290_v48 = vsel %vm1176_vm11, %v281_v25, %v286_v22  ;;  %v837_v62 = vpop.permute.xlu1 %836  ;;  %v832_v46 = vpop.permute.xlu0 %831  ;;  %p921_p5 = por %p920_p4, %p919_p3 }
 0x3a8   :  { %312 = vmatpush1.bf16.msra.mxu1 %v292_v17  ;;  %v295_v32 = vpack.c.bf16 %v1296_v34, %v289_v26  ;;  %v294_v18 = vpack.c.bf16 %v1292_v15, %v288_v29  ;;  %v299_v34 = vpack.c.bf16 %v275_v38, %v259_v37  ;;  %v258_v15 = vsel %vm1176_vm11, %v249_v51, %v254_v2 }
 0x3a9   :  { %v298_v61 = vpack.c.bf16 %v274_v39, %v258_v15  ;;  %v301_v49 = vpack.c.bf16 %v291_v40, %v291_v40  ;;  %v300_v52 = vpack.c.bf16 %v290_v48, %v290_v48  ;;  %v839_v21 = vunpack.i.h.bf16 %v837_v62  ;;  %p922_p6 = pnand %p921_p5, %p915_p2 }
 0x3aa   :  { %313 = vmatprep.subr.bf16.mxu1 %v295_v32  ;;  %v838_v54 = vunpack.i.l.bf16 %v837_v62  ;;  %v834_v55 = vunpack.i.h.bf16 %v832_v46  ;;  %v833_v58 = vunpack.i.l.bf16 %v832_v46  ;;  %v589_v15 = vpack.c.bf16 %v1340_v36, %v519_v4 }
 0x3ab   :  { %v306_v59 = vsel %vm159_vm12, %v300_v52, 0 }
 0x3ac   :  { %314 = vmatpush1.bf16.msra.mxu1 %v294_v18  ;;  %v562_v50 = vsel %vm98_vm7, %v838_v54, %v839_v21  ;;  %v563_v28 = vsel %vm98_vm7, %v839_v21, %v838_v54  ;;  %v556_v42 = vsel %vm91_vm6, %v833_v58, %v834_v55  ;;  %v557_v45 = vsel %vm91_vm6, %v834_v55, %v833_v58 }
 0x3ad   :  { %315 = vmatprep.subr.bf16.mxu1 %v297_v19  ;;  %v565_v12 = vsel %vm1113_vm8, %v563_v28, %v556_v42  ;;  %v564_v17 = vsel %vm1117_vm9, %v562_v50, %v557_v45  ;;  %v567_v57 = vsel %vm1166_vm10, %v556_v42, %v563_v28  ;;  %v566_v5 = vsel %vm1176_vm11, %v557_v45, %v562_v50 }
 0x3b0   :  { %316 = vmatpush1.bf16.msra.mxu1 %v296_v20 }
 0x3b1   :  { %317 = vmatprep.subr.bf16.mxu1 %v299_v34 }
 0x3b4   :  { %318 = vmatpush1.bf16.msra.mxu1 %v298_v61 }
 0x3b5   :  { %685 = vmatprep.subr.msk.bf16.mxu1 %vm159_vm12, %v301_v49 }
 0x3b8   :  { %320 = vmatpush1.bf16.msra.mxu1 %v306_v59 }
 0x3b9   :  { %v847_v6 = vpop.permute.xlu1 %846  ;;  %v842_v35 = vpop.permute.xlu0 %841 }
 0x3ba   :  { %v849_v51 = vunpack.i.h.bf16 %v847_v6  ;;  %v848_v2 = vunpack.i.l.bf16 %v847_v6  ;;  %v844_v44 = vunpack.i.h.bf16 %v842_v35  ;;  %v843_v8 = vunpack.i.l.bf16 %v842_v35 }
 0x3bb   :  { %686 = vmatmul.mubr.msk.bf16.vlgmr.msra.gmra.mrb[0].mxu1 %vm155_vm13, %v58_v3 }
 0x3bc   :  { %v546_v9 = vsel %vm98_vm7, %v848_v2, %v849_v51  ;;  %v547_v10 = vsel %vm98_vm7, %v849_v51, %v848_v2  ;;  %v540_v13 = vsel %vm91_vm6, %v843_v8, %v844_v44  ;;  %v541_v14 = vsel %vm91_vm6, %v844_v44, %v843_v8  ;;  %632 = vmatprep.mubr.bf16.mxu1 %v949_v47 }
 0x3bd   :  { %v857_v60 = vpop.permute.xlu1 %856  ;;  %v852_v63 = vpop.permute.xlu0 %851  ;;  %v549_v11 = vsel %vm1113_vm8, %v547_v10, %v540_v13  ;;  %v548_v16 = vsel %vm1117_vm9, %v546_v9, %v541_v14  ;;  %v551_v7 = vsel %vm1166_vm10, %v540_v13, %v547_v10 }
 0x3be   :  { %v859_v22 = vunpack.i.h.bf16 %v857_v60  ;;  %v858_v23 = vunpack.i.l.bf16 %v857_v60  ;;  %v854_v24 = vunpack.i.h.bf16 %v852_v63  ;;  %v853_v25 = vunpack.i.l.bf16 %v852_v63 }
 0x3bf   :  { %v585_v26 = vpack.c.bf16 %v565_v12, %v549_v11  ;;  %v584_v47 = vpack.c.bf16 %v564_v17, %v548_v16 }
 0x3c0   :  { %v578_v29 = vsel %vm98_vm7, %v858_v23, %v859_v22  ;;  %v579_v32 = vsel %vm98_vm7, %v859_v22, %v858_v23  ;;  %v572_v18 = vsel %vm91_vm6, %v853_v25, %v854_v24  ;;  %v573_v19 = vsel %vm91_vm6, %v854_v24, %v853_v25 }
 0x3c1   :  { %600 = vmatprep.subr.bf16.mxu1 %v585_v26  ;;  %v581_v37 = vsel %vm1113_vm8, %v579_v32, %v572_v18  ;;  %v580_v20 = vsel %vm1117_vm9, %v578_v29, %v573_v19  ;;  %v583_v27 = vsel %vm1166_vm10, %v572_v18, %v579_v32  ;;  %v582_v4 = vsel %vm1176_vm11, %v573_v19, %v578_v29 }
 0x3c2   :  { %601 = vmatpush1.bf16.msra.mxu1 %v584_v47  ;;  %v587_v38 = vpack.c.bf16 %v1330_v31, %v581_v37  ;;  %v586_v34 = vpack.c.bf16 %v1326_v30, %v580_v20  ;;  %v591_v31 = vpack.c.bf16 %v567_v57, %v551_v7  ;;  %v550_v30 = vsel %vm1176_vm11, %v541_v14, %v546_v9 }
 0x3c3   :  { %v590_v36 = vpack.c.bf16 %v566_v5, %v550_v30  ;;  %v593_v41 = vpack.c.bf16 %v583_v27, %v583_v27  ;;  %v592_v33 = vpack.c.bf16 %v582_v4, %v582_v4 }
 0x3c4   :  { %602 = vmatprep.subr.bf16.mxu1 %v587_v38 }
 0x3c5   :  { %v595_v40 = vsel %vm159_vm12, %v592_v33, 0 }
 0x3c6   :  { %603 = vmatpush1.bf16.msra.mxu1 %v586_v34 }
 0x3c7   :  { %604 = vmatprep.subr.bf16.mxu1 %v589_v15 }
 0x3ca   :  { %605 = vmatpush1.bf16.msra.mxu1 %v588_v56 }
 0x3cb   :  { %606 = vmatprep.subr.bf16.mxu1 %v591_v31 }
 0x3ce   :  { %607 = vmatpush1.bf16.msra.mxu1 %v590_v36 }
 0x3cf   :  { %689 = vmatprep.subr.msk.bf16.mxu1 %vm159_vm12, %v593_v41 }
 0x3d2   :  { %609 = vmatpush1.bf16.msra.mxu1 %v595_v40 }
 0x3d5   :  { %690 = vmatmul.mubr.msk.bf16.vlgmr.msra.gmra.mrb[4].mxu1 %vm155_vm13, %v58_v3 }
 0x48e   :  { %v345_v43 = vpop.f32.mrb[0].mxu1 }
 0x48f   :  { %v347_v48 = vpop.f32.mrb[1].mxu1  ;;  %v355_v39 = vmul.f32 %v345_v43, %v345_v43 }
 0x490   :  { %v352_v62 = vadd.f32 %v347_v48, %v345_v43  ;;  %v349_v46 = vpop.f32.mrb[2].mxu1  ;;  %v356_v61 = vmul.f32 %v347_v48, %v347_v48 }
 0x491   :  { %v350_v49 = vpop.f32.mrb[3].mxu1 }
 0x492   :  { %353 = vadd.xlane.f32.xlu0 %v352_v62  ;;  %v357_v53 = vadd.f32 %v356_v61, %v355_v39 }
 0x496   :  { %358 = vadd.xlane.f32.xlu0 %v357_v53 }
 0x4a8   :  { %v634_v52 = vpop.f32.mrb[4].mxu1 }
 0x4a9   :  { %v636_v21 = vpop.f32.mrb[5].mxu1  ;;  %v644_v54 = vmul.f32 %v634_v52, %v634_v52 }
 0x4aa   :  { %v638_v55 = vpop.f32.mrb[6].mxu1  ;;  %v641_v58 = vadd.f32 %v636_v21, %v634_v52  ;;  %v645_v59 = vmul.f32 %v636_v21, %v636_v21 }
 0x4ab   :  { %v639_v50 = vpop.f32.mrb[7].mxu1 }
 0x4ac   :  { %642 = vadd.xlane.f32.xlu1 %v641_v58  ;;  %v646_v28 = vadd.f32 %v645_v59, %v644_v54 }
 0x4ae   :  { %647 = vadd.xlane.f32.xlu0 %v646_v28 }
 0x51f   :  { %v354_v3 = vpop.xlane.xlu0 %353 }
 0x520   :  { %v360_v42 = vmul.f32 0.00390625, %v354_v3 }
 0x522   :  { %v362_v45 = vmul.f32 %v360_v42, %v360_v42  ;;  %v365_v8 = vsub.f32 %v345_v43, %v360_v42  ;;  %v366_v9 = vsub.f32 %v347_v48, %v360_v42 }
 0x523   :  { %v359_v6 = vpop.xlane.xlu0 %358 }
 0x524   :  { %v361_v35 = vmul.f32 0.00390625, %v359_v6 }
 0x526   :  { %v363_v51 = vsub.f32 %v361_v35, %v362_v45 }
 0x528   :  { %v364_v2 = vmax.f32 %v363_v51, 0.0 }
 0x52a   :  { %v367_v44 = vadd.f32 1e-05, %v364_v2 }
 0x52c   :  { %864 = vrsqrt.f32 %v367_v44 }
 0x536   :  { %v865_v10 = vpop.eup %864 }
 0x537   :  { %v369_v13 = vmul.f32 %v865_v10, %v365_v8  ;;  %v370_v14 = vmul.f32 %v865_v10, %v366_v9 }
 0x539   :  { %v643_v60 = vpop.xlane.xlu1 %642  ;;  %v371_v63 = vadd.f32 %v369_v13, %v998_v0  ;;  %v372_v11 = vadd.f32 %v370_v14, %v1000_v1  ;;  %v868_v0 = vld [vmem:[#allocation2 + $0x10] sm:$0xff]  ;;  %v869_v1 = vld [vmem:[#allocation2 + $0x18] sm:$0xff] }
 0x53a   :  { %v649_v12 = vmul.f32 0.00390625, %v643_v60 }
 0x53b   :  { %v648_v16 = vpop.xlane.xlu0 %647  ;;  %373 = vst [vmem:[#allocation7] sm:$0xff] %v371_v63  ;;  %374 = vst [vmem:[#allocation7 + $0x8] sm:$0xff] %v372_v11 }
 0x53c   :  { %v650_v17 = vmul.f32 0.00390625, %v648_v16  ;;  %v651_v22 = vmul.f32 %v649_v12, %v649_v12  ;;  %v654_v26 = vsub.f32 %v634_v52, %v649_v12  ;;  %v655_v47 = vsub.f32 %v636_v21, %v649_v12 }
 0x53e   :  { %v652_v23 = vsub.f32 %v650_v17, %v651_v22 }
 0x540   :  { %v653_v24 = vmax.f32 %v652_v23, 0.0 }
 0x542   :  { %v656_v25 = vadd.f32 1e-05, %v653_v24 }
 0x544   :  { %866 = vrsqrt.f32 %v656_v25 }
 0x54e   :  { %v867_v29 = vpop.eup %866 }
 0x54f   :  { %v658_v32 = vmul.f32 %v867_v29, %v654_v26  ;;  %v659_v18 = vmul.f32 %v867_v29, %v655_v47 }
 0x551   :  { %v660_v19 = vadd.f32 %v868_v0, %v658_v32  ;;  %v661_v37 = vadd.f32 %v869_v1, %v659_v18 }
 0x553   :  { %663 = vst [vmem:[#allocation7 + $0x10] sm:$0xff] %v660_v19  ;;  %664 = vst [vmem:[#allocation7 + $0x18] sm:$0xff] %v661_v37 }
 0x554   :  { %925 = shalt.err (!%p922_p6)
}
 0x555   :  { %s926_s18 = scalar_lea.hbm %s1490_s3, 512 }
 0x556   :  { %p927_p7 = scmp.ne.s32.totalorder %s1490_s3, %s926_s18  ;;  %p930_p8 = scmp.lt.u32.totalorder %s926_s18, %s1490_s3 }
 0x558   :  { %p932_p9 = pnand %p930_p8, %p927_p7 }
 0x55a   :  { %935 = shalt.err (!%p932_p9)
}
 0x55b   :  { %676 = dma.vmem_to_hbm [thread:$0]  %s671_s14, 512, %s1490_s3, [#allocation4], %s943_s22, %s943_s22, %s944_s23  }
 0x55c   :  { %940 = dma.done.wait [#allocation4], 512  }
 0x55d   :  { %941 = vsyncadd [#allocation4], 4294966784 }
 0x55e   :  { %680 = vsyncpa [#allocation3], 1 }
 0x55f   :  { %681 = vsyncpa [#allocation6], 1 }
 0x560   :  { %682 = vsyncpa [#allocation4], 1 }

</bundles_post_ra>
